<compile_context>
chip_gen: v7x
topology: tpu7x:2x2x1
jax: 0.10.0
libtpu: 0.0.40
codegen_flags: <defaults>
</compile_context>

<pallas_src>
import jax
import jax.numpy as jnp
from jax.experimental import pallas as pl
from jax.experimental.pallas import tpu as pltpu


def _softplus_f32(v):
    # Single-path numerically stable softplus == log(1 + exp(v)); matches
    # torch.nn.functional.softplus.  1 exp + 1 log1p through the EUP.
    v = v.astype(jnp.float32)
    return jnp.maximum(v, 0.0) + jnp.log1p(jnp.exp(-jnp.abs(v)))


def _dg_kernel(mu_ref, sp_ref, eps_ref, mu_out_ref, sigma_out_ref, z_out_ref):
    """mu_ref / sp_ref / eps_ref: (TB, L) input tiles; three (TB, L) outputs."""
    mu = mu_ref[...].astype(jnp.float32)
    sigma = _softplus_f32(sp_ref[...])
    eps = eps_ref[...].astype(jnp.float32)

    mu_out_ref[...] = mu.astype(mu_out_ref.dtype)
    sigma_out_ref[...] = sigma.astype(sigma_out_ref.dtype)
    z_out_ref[...] = (eps * sigma + mu).astype(z_out_ref.dtype)


def _bytes_per_row(L, in_itemsize, out_itemsize):
    # Per batch row resident in VMEM, double-buffered by the pipeline:
    #   inputs : mu + sigma_param (in_itemsize) + eps (f32)
    #   outputs: mu + sigma + z_sample (out_itemsize)
    return 2 * L * (2 * in_itemsize + 4 + 3 * out_itemsize)


def _pick_block_rows(B, L, in_itemsize, out_itemsize, vmem_budget_bytes,
                     min_grid_steps=8):
    """Largest power-of-two row block that fits the VMEM budget while keeping
    at least `min_grid_steps` grid steps (pipelining + v7x megacore sharding)."""
    cap = max(8, vmem_budget_bytes // max(_bytes_per_row(L, in_itemsize, out_itemsize), 1))
    target = max(8, B // min_grid_steps)
    tb = 8
    while tb * 2 <= min(cap, target):
        tb *= 2
    return min(tb, B)


def diagonal_gaussian_latent(x, num_latents, *, key=None, seed=0,
                             block_rows=None, out_dtype=None,
                             vmem_budget_bytes=24 * 1024 * 1024):
    """Pallas forward for DiagonalGaussianLatent.

    Args:
      x: (B, 2 * num_latents) array; columns [0, L) are mu, [L, 2L) the
         pre-softplus sigma parameter (== torch.split(x, num_latents, dim=1)).
      num_latents: L.
      key / seed: JAX PRNG key (or int seed) for the reparameterization noise.
      block_rows: optional batch tile size override.
      out_dtype: dtype for all outputs (default x.dtype); e.g. bfloat16 halves
                 the kernel's write bandwidth, compute stays f32.
      vmem_budget_bytes: VMEM budget for the (double-buffered) row block.

    Returns:
      dict with 'z_hat', 'z_sample', 'z_sigma', 'z_mu' (each (B, L), out_dtype).
    """
    B, two_l = x.shape
    L = num_latents
    assert two_l == 2 * L, (two_l, L)
    out_dtype = jnp.dtype(x.dtype if out_dtype is None else out_dtype)
    in_itemsize = jnp.dtype(x.dtype).itemsize

    if key is None:
        key = jax.random.PRNGKey(seed)
    eps = jax.random.normal(key, (B, L), dtype=jnp.float32)

    if block_rows is None:
        TB = _pick_block_rows(B, L, in_itemsize, out_dtype.itemsize, vmem_budget_bytes)
    else:
        TB = min(int(block_rows), B)
    grid = (pl.cdiv(B, TB),)  # ragged last block is handled by Pallas

    if L % 128 == 0:
        # Lane-aligned fast path: pass x twice; column-block index 0 -> mu
        # half, 1 -> sigma half.  No wrapper copies, no in-kernel split.
        mu_in, sp_in = x, x
        mu_spec = pl.BlockSpec((TB, L), lambda i: (i, 0))
        sp_spec = pl.BlockSpec((TB, L), lambda i: (i, 1))
    else:
        # General-L path: wrapper-side split so each input's last block dim
        # equals its full array dim (always legal; lane-sparse if L < 128).
        # TODO(synk): for L not a multiple of 128 this pays an extra XLA-level
        # slice copy per half instead of an in-kernel lane-offset relayout.
        mu_in, sp_in = x[:, :L], x[:, L:]
        mu_spec = pl.BlockSpec((TB, L), lambda i: (i, 0))
        sp_spec = pl.BlockSpec((TB, L), lambda i: (i, 0))

    eps_spec = pl.BlockSpec((TB, L), lambda i: (i, 0))
    out_spec = pl.BlockSpec((TB, L), lambda i: (i, 0))
    out_sds = jax.ShapeDtypeStruct((B, L), out_dtype)

    # Explicit VMEM limit: what the pipeline actually needs plus headroom,
    # never below the 16 MiB v5e scoped default.
    vmem_needed = TB * _bytes_per_row(L, in_itemsize, out_dtype.itemsize)
    vmem_limit = int(max(vmem_needed + (4 << 20), 16 << 20))

    cost = pl.CostEstimate(
        flops=8 * B * L,
        transcendentals=2 * B * L,                      # exp + log1p per latent
        bytes_accessed=(2 * B * L * in_itemsize         # mu + sigma_param reads
                        + 4 * B * L                     # eps read (f32)
                        + 3 * B * L * out_dtype.itemsize),  # 3 output writes
    )

    mu_out, sigma, z_sample = pl.pallas_call(
        _dg_kernel,
        out_shape=(out_sds, out_sds, out_sds),
        grid=grid,
        in_specs=[mu_spec, sp_spec, eps_spec],
        out_specs=(out_spec, out_spec, out_spec),
        compiler_params=pltpu.CompilerParams(
            dimension_semantics=("parallel",),
            vmem_limit_bytes=vmem_limit,
        ),
        cost_estimate=cost,
    )(mu_in, sp_in, eps)

    return {"z_hat": mu_out, "z_sample": z_sample, "z_sigma": sigma, "z_mu": mu_out}


if __name__ == "__main__":
    # --- Fast (lane-aligned) path: L multiple of 128 -------------------------
    num_latents = 128
    B = 16

    key = jax.random.PRNGKey(0)
    x = jax.random.normal(key, (B, 2 * num_latents), dtype=jnp.float32)

    outs = diagonal_gaussian_latent(x, num_latents, seed=42, block_rows=8)
    jax.block_until_ready(outs)

    mu_ref = x[:, :num_latents]
    sigma_ref = jax.nn.softplus(x[:, num_latents:])
    eps_ref = jax.random.normal(jax.random.PRNGKey(42), (B, num_latents),
                                dtype=jnp.float32)
    z_ref = eps_ref * sigma_ref + mu_ref

    assert jnp.allclose(outs["z_mu"], mu_ref, atol=1e-6)
    assert jnp.allclose(outs["z_hat"], mu_ref, atol=1e-6)
    assert jnp.allclose(outs["z_sigma"], sigma_ref, atol=1e-5, rtol=1e-5)
    assert jnp.allclose(outs["z_sample"], z_ref, atol=1e-5, rtol=1e-5)
    assert bool(jnp.all(jnp.isfinite(outs["z_sample"])))

    # Determinism: same seed -> identical sample.
    outs_rep = diagonal_gaussian_latent(x, num_latents, seed=42, block_rows=8)
    jax.block_until_ready(outs_rep)
    assert bool(jnp.array_equal(outs["z_sample"], outs_rep["z_sample"]))

    # --- General-L path: L not a multiple of 128 -----------------------------
    L2 = 96
    x2 = jax.random.normal(jax.random.PRNGKey(1), (B, 2 * L2), dtype=jnp.float32)
    outs2 = diagonal_gaussian_latent(x2, L2, seed=7)
    jax.block_until_ready(outs2)

    mu2 = x2[:, :L2]
    sg2 = jax.nn.softplus(x2[:, L2:])
    z2 = jax.random.normal(jax.random.PRNGKey(7), (B, L2), dtype=jnp.float32) * sg2 + mu2
    assert jnp.allclose(outs2["z_mu"], mu2, atol=1e-6)
    assert jnp.allclose(outs2["z_sigma"], sg2, atol=1e-5, rtol=1e-5)
    assert jnp.allclose(outs2["z_sample"], z2, atol=1e-5, rtol=1e-5)

    print("KERNEL_OK")
</pallas_src>

<mosaic_0001>
module attributes {stable_mosaic.version = 11 : i64} {
  func.func @_dg_kernel(%arg0: i32, %arg1: memref<8x128xf32, #tpu.memory_space<vmem>>, %arg2: memref<8x128xf32, #tpu.memory_space<vmem>>, %arg3: memref<8x128xf32, #tpu.memory_space<vmem>>, %arg4: memref<8x128xf32, #tpu.memory_space<vmem>>, %arg5: memref<8x128xf32, #tpu.memory_space<vmem>>, %arg6: memref<8x128xf32, #tpu.memory_space<vmem>>) attributes {dimension_semantics = [#tpu.dimension_semantics<parallel>], iteration_bounds = array<i64: 2>, scalar_prefetch = 0 : i64, scratch_operands = 0 : i64, tpu.core_type = #tpu.core_type<tc>, window_params = [{transform_indices = @transform_0, window_bounds = array<i64: 8, 128>}, {transform_indices = @transform_1, window_bounds = array<i64: 8, 128>}, {transform_indices = @transform_2, window_bounds = array<i64: 8, 128>}, {transform_indices = @transform_3, window_bounds = array<i64: 8, 128>}, {transform_indices = @transform_4, window_bounds = array<i64: 8, 128>}, {transform_indices = @transform_5, window_bounds = array<i64: 8, 128>}]} {
    %c0 = arith.constant 0 : index
    %c0_0 = arith.constant 0 : index
    %0 = vector.load %arg1[%c0, %c0_0] : memref<8x128xf32, #tpu.memory_space<vmem>>, vector<8x128xf32>
    %c0_1 = arith.constant 0 : index
    %c0_2 = arith.constant 0 : index
    %1 = vector.load %arg2[%c0_1, %c0_2] : memref<8x128xf32, #tpu.memory_space<vmem>>, vector<8x128xf32>
    %cst = arith.constant 0.000000e+00 : f32
    %2 = vector.broadcast %cst : f32 to vector<8x128xf32>
    %3 = arith.maximumf %1, %2 : vector<8x128xf32>
    %4 = math.absf %1 : vector<8x128xf32>
    %cst_3 = arith.constant 0.000000e+00 : f32
    %5 = vector.broadcast %cst_3 : f32 to vector<8x128xf32>
    %6 = arith.subf %5, %4 : vector<8x128xf32>
    %7 = math.exp %6 : vector<8x128xf32>
    %8 = math.log1p %7 : vector<8x128xf32>
    %9 = arith.addf %3, %8 : vector<8x128xf32>
    %c0_4 = arith.constant 0 : index
    %c0_5 = arith.constant 0 : index
    %10 = vector.load %arg3[%c0_4, %c0_5] : memref<8x128xf32, #tpu.memory_space<vmem>>, vector<8x128xf32>
    %c0_6 = arith.constant 0 : index
    %c0_7 = arith.constant 0 : index
    %11 = vector.load %arg4[%c0_6, %c0_7] : memref<8x128xf32, #tpu.memory_space<vmem>>, vector<8x128xf32>
    tpu.vector_store %arg4[%c0_6, %c0_7], %0 {strides = array<i32>} : memref<8x128xf32, #tpu.memory_space<vmem>>, vector<8x128xf32>,
    %c0_8 = arith.constant 0 : index
    %c0_9 = arith.constant 0 : index
    %12 = vector.load %arg5[%c0_8, %c0_9] : memref<8x128xf32, #tpu.memory_space<vmem>>, vector<8x128xf32>
    tpu.vector_store %arg5[%c0_8, %c0_9], %9 {strides = array<i32>} : memref<8x128xf32, #tpu.memory_space<vmem>>, vector<8x128xf32>,
    %13 = arith.mulf %10, %9 : vector<8x128xf32>
    %14 = arith.addf %13, %0 : vector<8x128xf32>
    %c0_10 = arith.constant 0 : index
    %c0_11 = arith.constant 0 : index
    %15 = vector.load %arg6[%c0_10, %c0_11] : memref<8x128xf32, #tpu.memory_space<vmem>>, vector<8x128xf32>
    tpu.vector_store %arg6[%c0_10, %c0_11], %14 {strides = array<i32>} : memref<8x128xf32, #tpu.memory_space<vmem>>, vector<8x128xf32>,
    return
  }
  func.func @transform_0(%arg0: i32) -> (i32, i32) {
    %c0_i32 = arith.constant 0 : i32
    %c0_i32_0 = arith.constant 0 : i32
    return %arg0, %c0_i32 : i32, i32
  }
  func.func @transform_1(%arg0: i32) -> (i32, i32) {
    %c1_i32 = arith.constant 1 : i32
    %c0_i32 = arith.constant 0 : i32
    return %arg0, %c1_i32 : i32, i32
  }
  func.func @transform_2(%arg0: i32) -> (i32, i32) {
    %c0_i32 = arith.constant 0 : i32
    %c0_i32_0 = arith.constant 0 : i32
    return %arg0, %c0_i32 : i32, i32
  }
  func.func @transform_3(%arg0: i32) -> (i32, i32) {
    %c0_i32 = arith.constant 0 : i32
    %c0_i32_0 = arith.constant 0 : i32
    return %arg0, %c0_i32 : i32, i32
  }
  func.func @transform_4(%arg0: i32) -> (i32, i32) {
    %c0_i32 = arith.constant 0 : i32
    %c0_i32_0 = arith.constant 0 : i32
    return %arg0, %c0_i32 : i32, i32
  }
  func.func @transform_5(%arg0: i32) -> (i32, i32) {
    %c0_i32 = arith.constant 0 : i32
    %c0_i32_0 = arith.constant 0 : i32
    return %arg0, %c0_i32 : i32, i32
  }
}

</mosaic_0001>

<bundles_post_ra>
// kernel: tpu_custom_call.1
= control target key start
LH: loop header
LB: loop body
LE: loop exit
PB: predicated region body
PF: predicated region fallthrough
CT: control target
= control target key end

     0   :  { %s1257_s0 = inlined_call_operand.hbm [shape: f32[16,256], index: 0, kind: input, shape index: {}]   ;;  %s1258_s1 = inlined_call_operand.hbm [shape: f32[16,256], index: 1, kind: input, shape index: {}]   ;;  %s1259_s2 = inlined_call_operand.hbm [shape: f32[16,128], index: 2, kind: input, shape index: {}]   ;;  %s1260_s3 = inlined_call_operand.hbm [shape: f32[16,128], index: 3, kind: output, shape index: {0}]   ;;  %s1261_s4 = inlined_call_operand.hbm [shape: f32[16,128], index: 4, kind: output, shape index: {1}]   ;;  %s1262_s5 = inlined_call_operand.hbm [shape: f32[16,128], index: 5, kind: output, shape index: {2}]  }
   0x1   :  { %1268 = sst [smem:[#allocation17_spill]] %s1258_s1 }
   0x2   :  { %11 = vsyncpa [#allocation3], 0 }
   0x3   :  { %13 = vsyncpa [#allocation3 + $0x1], 0 }
   0x4   :  { %14 = vsyncpa [#allocation6], 0 }
   0x5   :  { %16 = vsyncpa [#allocation6 + $0x1], 0 }
   0x6   :  { %17 = vsyncpa [#allocation4], 0 }
   0x7   :  { %19 = vsyncpa [#allocation4 + $0x1], 0 }
   0x8   :  { %20 = vsyncpa [#allocation10], 0 }
   0x9   :  { %22 = vsyncpa [#allocation10 + $0x1], 0  ;;  %s938_s18 = smov 0   ;;  %s940_s19 = smov 0  }
   0xa   :  { %s942_s20 = smov 0   ;;  %s944_s21 = smov 0  }
   0xb LB: > { %s959_s22 = sadd.s32 4294967295, %s900_s21   ;;  %s1263_s23 = sadd.s32 4294967294, %s900_s21   ;;  %s900_s21 = sphi %s944_s21, %s1289_s21   ;;  %s896_s20 = sphi %s942_s20, %s1288_s20   ;;  %s892_s19 = sphi %s940_s19, %s1287_s19   ;;  %s888_s18 = sphi %s938_s18, %s1286_s18  }
   0xc   : > { %s963_s24 = sadd.s32 1, %s900_s21   ;;  %s35_s25 = sadd.s32 1, %s896_s20 }
   0xd   : > { %s32_s26 = ssub.s32 %s900_s21, %s963_s24  ;;  %p42_p0 = scmp.ne.s32.totalorder %s896_s20, %s892_s19 }
   0xe   : > { %p33_p1 = scmp.eq.s32.totalorder %s32_s26, 0  ;;  %p43_p2 = scmp.eq.s32.totalorder %s900_s21, 0 }
   0xf   : > { %p48_p3 = scmp.ne.s32.totalorder %s892_s19, %s888_s18  ;;  %p49_p4 = scmp.eq.s32.totalorder %s959_s22, 0 }
  0x10   : > { %s975_s27 = scalar_select %p33_p1, %s896_s20, %s35_s25  }
  0x11   : > { %p44_p5 = por %p43_p2, %p42_p0  ;;  %p977_p6 = por %p49_p4, %p48_p3 }
  0x12   : > { %1269 = sst [smem:[#allocation16_spill]] %s975_s27  ;;  %p124_p7 = scmp.eq.s32.totalorder %s959_s22, 1 }
  0x13   : > { %s1270_s28 = scalar_select %p977_p6, 1, 0 }
  0x14   : > { %p130_p8 = scmp.eq.s32.totalorder %s1263_s23, 1  ;;  %p641_p10 = scmp.lt.s32.totalorder %s900_s21, 2 }
  0x15   : > { %p986_p11 = por %p124_p7, %p42_p0  ;;  %s1264_s6 = sand.u32 1, %s896_s20  }
  0x16   : > { %p990_p12 = por %p130_p8, %p48_p3  ;;  %s607_s7 = sshll.u32 %s900_s21, 8 }
  0x17   : > { %s1271_s29 = scalar_select %p986_p11, 1, 0 }
  0x18   : > { %s1272_s30 = scalar_select %p990_p12, 1, 0 }
  0x19   : > { %s998_s8 = sshll.u32 %s1264_s6, 3  ;;  %p1000_p13 = pnand %p641_p10, %p44_p5 }
  0x1a   : > { %s221_s10 = sand.u32 1, %s900_s21   ;;  %s1274_s1 = sld [smem:[#allocation17_spill]] }
  0x1b   : > { %s1273_s9 = scalar_select %p1000_p13, 1, 0 }
  0x1c   : > { %s225_s14 = scalar_lea.vmem [#allocation5], %s998_s8  ;;  %s1015_s17 = scalar_lea.sflag [#allocation6], %s221_s10 }
  0x1d   : > { %s234_s15 = sshll.u32 %s225_s14, 4  ;;  %p1020_p1 = pneg %p1000_p13  ;;  %s1013_s15 = int_to_ptr.vmem [resolvable:$true] %s234_s15 }
  0x20   : > { %s463_s13 = scalar_lea.hbm %s1274_s1, %s607_s7  ;;  %s684_s14 = scalar_lea.hbm %s1274_s1, 512 }
  0x21   : > { %s1011_s16 = scalar_lea.hbm %s463_s13, 128  ;;  %s709_s25 = scalar_lea.hbm %s463_s13, 256 }
  0x22   : > { %p680_p0 = scmp.ne.s32.totalorder %s1011_s16, %s709_s25  ;;  %p685_p4 = scmp.lt.u32.totalorder %s1011_s16, %s1274_s1 }
  0x23   : > { %p686_p5 = scmp.lt.u32.totalorder %s684_s14, %s709_s25  ;;  %p688_p8 = scmp.lt.u32.totalorder %s709_s25, %s1011_s16 }
  0x24   : > { %p682_p2 = pnand %p1020_p1, %p680_p0 }
  0x25   : > { %p687_p7 = por %p686_p5, %p685_p4 }
  0x26   : > { %p683_p3 = pneg %p682_p2 }
  0x27   : > { %p689_p10 = por %p688_p8, %p687_p7 }
  0x29   : > { %p690_p9 = pnand %p689_p10, %p683_p3 }
  0x2b   : > { %693 = shalt.err (!%p690_p9)
}
  0x2c   : > { %s694_s10 = scalar_lea.vmem %s1013_s15, 128  ;;  %s902_s13 = smov [#allocation5]  }
  0x2d   : > { %p695_p0 = scmp.ne.s32.totalorder %s1013_s15, %s694_s10  ;;  %s699_s11 = sshll.u32 %s902_s13, 4  ;;  %s700_s11 = int_to_ptr.vmem [resolvable:$false] %s699_s11 }
  0x2e   : > { %s701_s23 = scalar_lea.vmem %s700_s11, 256  ;;  %p702_p11 = scmp.lt.s32.totalorder %s1013_s15, %s700_s11 }
  0x2f   : > { %p697_p2 = pnand %p695_p0, %p1020_p1  ;;  %p703_p6 = scmp.lt.s32.totalorder %s701_s23, %s694_s10 }
  0x31   : > { %p698_p12 = pneg %p697_p2  ;;  %p704_p4 = por %p703_p6, %p702_p11 }
  0x33   : > { %p705_p5 = pnand %p704_p4, %p698_p12 }
  0x35   : > { %708 = shalt.err (!%p705_p5)
}
  0x36   : > { %627 = dma.hbm_to_vmem [thread:$0]  (!%p1000_p13), %s1011_s16, 128, %s1013_s15, %s1015_s17  }
  0x37   : > { %p592_p9 = scmp.ge.s32.totalorder %s900_s21, 1  ;;  %p257_p3 = scmp.lt.s32.totalorder %s900_s21, 3 }
  0x38   : > { %s1055_s14 = scalar_lea.hbm %s1257_s0, %s607_s7  ;;  %s206_s10 = scalar_lea.vmem [#allocation2], %s998_s8 }
  0x39   : > { %p1046_p7 = pnand %p592_p9, %p257_p3  ;;  %s214_s13 = sshll.u32 %s206_s10, 4  ;;  %s1058_s13 = int_to_ptr.vmem [resolvable:$true] %s214_s13 }
  0x3a   : > { %s591_s15 = sshll.u32 %s900_s21, 7  ;;  %s1277_s16 = sand.u32 1, %s896_s20  }
  0x3b   : > { %s1276_s6 = scalar_select %p1046_p7, 1, 0 }
  0x3c   : > { %s203_s11 = scalar_lea.sflag [#allocation3], %s1277_s16  ;;  %s710_s23 = scalar_lea.hbm %s1055_s14, 128 }
  0x3d   : > { %p711_p6 = scmp.ne.s32.totalorder %s1055_s14, %s710_s23  ;;  %s715_s7 = scalar_lea.hbm %s1257_s0, 512 }
  0x3e   : > { %p716_p8 = scmp.lt.u32.totalorder %s1055_s14, %s1257_s0  ;;  %p717_p10 = scmp.lt.u32.totalorder %s715_s7, %s710_s23 }
  0x3f   : > { %p713_p11 = pnand %p711_p6, %p1020_p1  ;;  %p719_p2 = scmp.lt.u32.totalorder %s710_s23, %s1055_s14 }
  0x40   : > { %p718_p0 = por %p717_p10, %p716_p8 }
  0x41   : > { %p714_p12 = pneg %p713_p11 }
  0x42   : > { %p720_p4 = por %p719_p2, %p718_p0 }
  0x44   : > { %p721_p5 = pnand %p720_p4, %p714_p12 }
  0x46   : > { %724 = shalt.err (!%p721_p5)
}
  0x47   : > { %s725_s10 = scalar_lea.vmem %s1058_s13, 128  ;;  %s903_s1 = smov [#allocation2]  }
  0x48   : > { %p726_p9 = scmp.ne.s32.totalorder %s1058_s13, %s725_s10  ;;  %s730_s16 = sshll.u32 %s903_s1, 4  ;;  %s731_s16 = int_to_ptr.vmem [resolvable:$false] %s730_s16 }
  0x49   : > { %s732_s27 = scalar_lea.vmem %s731_s16, 256  ;;  %p733_p11 = scmp.lt.s32.totalorder %s1058_s13, %s731_s16 }
  0x4a   : > { %p728_p3 = pnand %p726_p9, %p1020_p1  ;;  %p734_p7 = scmp.lt.s32.totalorder %s732_s27, %s725_s10 }
  0x4c   : > { %p729_p6 = pneg %p728_p3  ;;  %p735_p8 = por %p734_p7, %p733_p11 }
  0x4e   : > { %p736_p10 = pnand %p735_p8, %p729_p6 }
  0x50   : > { %739 = shalt.err (!%p736_p10)
}
  0x51   : > { %624 = dma.hbm_to_vmem [thread:$0]  (!%p1000_p13), %s1055_s14, 128, %s1058_s13, %s203_s11  }
  0x52   : > { %s1089_s7 = scalar_lea.hbm %s1259_s2, %s591_s15  ;;  %s245_s12 = scalar_lea.vmem [#allocation7], %s998_s8 }
  0x53   : > { %s252_s10 = sshll.u32 %s245_s12, 4  ;;  %s740_s1 = scalar_lea.hbm %s1089_s7, 128  ;;  %s253_s10 = int_to_ptr.vmem [resolvable:$true] %s252_s10 }
  0x54   : > { %p741_p7 = scmp.ne.s32.totalorder %s1089_s7, %s740_s1  ;;  %s745_s13 = scalar_lea.hbm %s1259_s2, 256 }
  0x55   : > { %p746_p2 = scmp.lt.u32.totalorder %s1089_s7, %s1259_s2  ;;  %p747_p4 = scmp.lt.u32.totalorder %s745_s13, %s740_s1 }
  0x56   : > { %p743_p12 = pnand %p741_p7, %p1020_p1  ;;  %p749_p9 = scmp.lt.u32.totalorder %s740_s1, %s1089_s7 }
  0x57   : > { %p748_p5 = por %p747_p4, %p746_p2 }
  0x58   : > { %p744_p0 = pneg %p743_p12 }
  0x59   : > { %p750_p3 = por %p749_p9, %p748_p5 }
  0x5b   : > { %p751_p6 = pnand %p750_p3, %p744_p0 }
  0x5d   : > { %754 = shalt.err (!%p751_p6)
}
  0x5e   : > { %s755_s8 = scalar_lea.vmem %s253_s10, 128  ;;  %s904_s15 = smov [#allocation7]  }
  0x5f   : > { %p756_p11 = scmp.ne.s32.totalorder %s253_s10, %s755_s8  ;;  %s760_s23 = sshll.u32 %s904_s15, 4  ;;  %s761_s23 = int_to_ptr.vmem [resolvable:$false] %s760_s23 }
  0x60   : > { %s762_s25 = scalar_lea.vmem %s761_s23, 256  ;;  %p763_p7 = scmp.lt.s32.totalorder %s253_s10, %s761_s23 }
  0x61   : > { %p758_p8 = pnand %p756_p11, %p1020_p1  ;;  %p764_p12 = scmp.lt.s32.totalorder %s762_s25, %s755_s8 }
  0x63   : > { %p759_p10 = pneg %p758_p8  ;;  %p765_p13 = por %p764_p12, %p763_p7 }
  0x65   : > { %p766_p2 = pnand %p765_p13, %p759_p10 }
  0x67   : > { %769 = shalt.err (!%p766_p2)
}
  0x68   : > { %p1278_p4 = scmp.ne.s32.totalorder %s1273_s9, 0  ;;  %p1279_p0 = scmp.ne.s32.totalorder %s1276_s6, 0 }
  0x69   : > { %s1113_s26 = sand.u32 (!%p1279_p0), 1, %s892_s19   ;;  %p1280_p13 = scmp.ne.s32.totalorder (!%p1279_p0), %s1270_s28, 0 }
  0x6a   : > { %630 = dma.hbm_to_vmem [thread:$0]  (!%p1278_p4), %s1089_s7, 128, %s253_s10, %s1015_s17  }
  0x6b   : > { %261 = sbr.rel (%p1279_p0) target bundleno = 213 (0xd5), region = 32  ;;  %s1116_s12 = sshll.u32 (!%p1279_p0), %s1113_s26, 3 }
  0x6c   : > { %s264_s1 = scalar_lea.sflag (!%p1279_p0), [#allocation3], %s1113_s26  ;;  %s267_s16 = scalar_lea.vmem (!%p1279_p0), [#allocation2], %s1116_s12 }
  0x72   : > { %871 = dma.done.wait (%p1280_p13), %s264_s1, 128  }
  0x73   : > { %873 = vsyncadd (%p1280_p13), %s264_s1, 4294967168  ;;  %s272_s9 = sand.u32 1, %s959_s22   ;;  %s276_s6 = scalar_lea.vmem [#allocation5], %s1116_s12 }
  0x74   : > { %s273_s17 = scalar_lea.sflag [#allocation6], %s272_s9 }
  0x75   : > { %875 = dma.done.wait (%p1280_p13), %s273_s17, 256  }
  0x76   : > { %877 = vsyncadd (%p1280_p13), %s273_s17, 4294967040  ;;  %s317_s7 = scalar_lea.vmem [#allocation8], %s1116_s12  ;;  %s1134_s14 = sshll.u32 %s959_s22, 7  ;;  %v333_v0 = vld [vmem:[%s276_s6] sm:$0xff]  ;;  %v1138_v1 = vld [vmem:[%s267_s16] sm:$0xff] }
  0x77   : > { %s379_s10 = sshll.u32 %s317_s7, 4  ;;  %s1144_s11 = scalar_lea.hbm %s1260_s3, %s1134_s14  ;;  %v335_v2 = vand.u32 2147483647, %v333_v0  ;;  %350 = vst [vmem:[%s317_s7] sm:$0xff] %v1138_v1  ;;  %s1136_s10 = int_to_ptr.vmem [resolvable:$true] %s379_s10 }
  0x78   : > { %s356_s27 = scalar_lea.sflag [#allocation4], %s1113_s26  ;;  %s770_s8 = scalar_lea.vmem %s1136_s10, 128 }
  0x79   : > { %p771_p1 = scmp.ne.s32.totalorder %s1136_s10, %s770_s8  ;;  %p1281_p5 = scmp.ne.s32.totalorder %s1271_s29, 0 }
  0x7a   : > { %s905_s15 = smov [#allocation8]  }
  0x7b   : > { %p772_p9 = pnand %p771_p1, %p1281_p5  ;;  %s774_s23 = sshll.u32 %s905_s15, 4  ;;  %s775_s23 = int_to_ptr.vmem [resolvable:$false] %s774_s23 }
  0x7c   : > { %s776_s25 = scalar_lea.vmem %s775_s23, 256  ;;  %p777_p6 = scmp.lt.s32.totalorder %s1136_s10, %s775_s23 }
  0x7d   : > { %p773_p3 = pneg %p772_p9  ;;  %p778_p11 = scmp.lt.s32.totalorder %s776_s25, %s770_s8 }
  0x7f   : > { %p779_p8 = por %p778_p11, %p777_p6 }
  0x81   : > { %p780_p10 = pnand %p779_p8, %p773_p3 }
  0x83   : > { %783 = shalt.err (!%p780_p10)
}
  0x84   : > { %s784_s26 = scalar_lea.hbm %s1144_s11, 128  ;;  %s788_s17 = scalar_lea.hbm %s1260_s3, 256 }
  0x85   : > { %p785_p7 = scmp.ne.s32.totalorder %s1144_s11, %s784_s26  ;;  %p789_p4 = scmp.lt.u32.totalorder %s1144_s11, %s1260_s3 }
  0x86   : > { %p790_p0 = scmp.lt.u32.totalorder %s788_s17, %s784_s26  ;;  %p792_p1 = scmp.lt.u32.totalorder %s784_s26, %s1144_s11 }
  0x87   : > { %p786_p12 = pnand %p785_p7, %p1281_p5 }
  0x88   : > { %p791_p13 = por %p790_p0, %p789_p4 }
  0x89   : > { %p787_p2 = pneg %p786_p12 }
  0x8a   : > { %p793_p9 = por %p792_p1, %p791_p13 }
  0x8c   : > { %p794_p3 = pnand %p793_p9, %p787_p2 }
  0x8e   : > { %797 = shalt.err (!%p794_p3)
}
  0x8f   : > { %615 = dma.vmem_to_hbm [thread:$0]  (%p1281_p5), %s1136_s10, 128, %s1144_s11, %s356_s27   ;;  %v336_v3 = vsub.f32 0.0, %v335_v2  ;;  %v334_v12 = vmax.f32 %v333_v0, 0.0 }
  0x90   : > { %s324_s13 = scalar_lea.vmem [#allocation9], %s1116_s12  ;;  %s285_s28 = scalar_lea.vmem [#allocation7], %s1116_s12 }
  0x91   : > { %v337_v4 = vmul.f32 1.442695, %v336_v3  ;;  %s392_s10 = sshll.u32 %s324_s13, 4  ;;  %v349_v15 = vld [vmem:[%s285_s28] sm:$0xff]  ;;  %s1177_s8 = scalar_lea.hbm %s1261_s4, %s1134_s14  ;;  %s1170_s10 = int_to_ptr.vmem [resolvable:$true] %s392_s10 }
  0x92   : > { %s331_s15 = scalar_lea.vmem [#allocation11], %s1116_s12  ;;  %s1186_s25 = scalar_lea.sflag [#allocation10], %s272_s9 }
  0x93   : > { %675 = vpow2.f32 %v337_v4  ;;  %s1182_s23 = sshll.u32 %s331_s15, 4  ;;  %s798_s26 = scalar_lea.vmem %s1170_s10, 128  ;;  %s1212_s23 = int_to_ptr.vmem [resolvable:$true] %s1182_s23 }
  0x94   : > { %p799_p6 = scmp.ne.s32.totalorder %s1170_s10, %s798_s26  ;;  %s906_s1 = smov [#allocation9]  }
  0x95   : > { %s802_s16 = sshll.u32 %s906_s1, 4  ;;  %s803_s16 = int_to_ptr.vmem [resolvable:$false] %s802_s16 }
  0x96   : > { %p800_p11 = pnand %p799_p6, %p1281_p5  ;;  %s804_s17 = scalar_lea.vmem %s803_s16, 256 }
  0x97   : > { %p805_p10 = scmp.lt.s32.totalorder %s1170_s10, %s803_s16  ;;  %p806_p7 = scmp.lt.s32.totalorder %s804_s17, %s798_s26 }
  0x98   : > { %p801_p8 = pneg %p800_p11 }
  0x99   : > { %p807_p12 = por %p806_p7, %p805_p10 }
  0x9b   : > { %p808_p2 = pnand %p807_p12, %p801_p8 }
  0x9d   : > { %v676_v5 = vpop.eup %675 }
  0x9e   : > { %v339_v6 = vadd.f32 1.0, %v676_v5  ;;  %v342_v7 = vmul.f32 -0.5, %v676_v5  ;;  %v345_v9 = vand.u32 2147483647, %v676_v5 }
  0xa0   : > { %677 = vlog2.f32 %v339_v6  ;;  %v343_v8 = vadd.f32 1.0, %v342_v7  ;;  %vm346_vm0 = vcmp.lt.f32.partialorder %v345_v9, 0.0004427343 }
  0xa2   : > { %v344_v10 = vmul.f32 %v676_v5, %v343_v8 }
  0xaa   : > { %v678_v11 = vpop.eup %677 }
  0xab   : > { %v341_v13 = vmul.f32 0.6931472, %v678_v11 }
  0xad   : > { %v347_v14 = vsel %vm346_vm0, %v344_v10, %v341_v13 }
  0xae   : > { %v348_v16 = vadd.f32 %v347_v14, %v334_v12 }
  0xb0   : > { %351 = vst [vmem:[%s324_s13] sm:$0xff] %v348_v16  ;;  %v352_v17 = vmul.f32 %v349_v15, %v348_v16 }
  0xb1   : > { %811 = shalt.err (!%p808_p2)
}
  0xb2   : > { %s812_s22 = scalar_lea.hbm %s1177_s8, 128  ;;  %s816_s7 = scalar_lea.hbm %s1261_s4, 256 }
  0xb3   : > { %p813_p4 = scmp.ne.s32.totalorder %s1177_s8, %s812_s22  ;;  %p817_p1 = scmp.lt.u32.totalorder %s1177_s8, %s1261_s4 }
  0xb4   : > { %p818_p9 = scmp.lt.u32.totalorder %s816_s7, %s812_s22  ;;  %p820_p6 = scmp.lt.u32.totalorder %s812_s22, %s1177_s8 }
  0xb5   : > { %p814_p0 = pnand %p813_p4, %p1281_p5 }
  0xb6   : > { %p819_p3 = por %p818_p9, %p817_p1 }
  0xb7   : > { %p815_p13 = pneg %p814_p0 }
  0xb8   : > { %p821_p11 = por %p820_p6, %p819_p3 }
  0xba   : > { %p822_p8 = pnand %p821_p11, %p815_p13 }
  0xbc   : > { %825 = shalt.err (!%p822_p8)
}
  0xbd   : > { %616 = dma.vmem_to_hbm [thread:$0]  (%p1281_p5), %s1170_s10, 128, %s1177_s8, %s1186_s25   ;;  %v353_v18 = vadd.f32 %v352_v17, %v1138_v1 }
  0xbe   : > { %s403_s26 = scalar_lea.hbm %s1262_s5, %s1134_s14  ;;  %s826_s1 = scalar_lea.vmem %s1212_s23, 128 }
  0xbf   : > { %354 = vst [vmem:[%s331_s15] sm:$0xff] %v353_v18  ;;  %p827_p10 = scmp.ne.s32.totalorder %s1212_s23, %s826_s1  ;;  %s907_s16 = smov [#allocation11]  }
  0xc0   : > { %s830_s10 = sshll.u32 %s907_s16, 4  ;;  %s831_s10 = int_to_ptr.vmem [resolvable:$false] %s830_s10 }
  0xc1   : > { %p828_p7 = pnand %p827_p10, %p1281_p5  ;;  %s832_s8 = scalar_lea.vmem %s831_s10, 256 }
  0xc2   : > { %p833_p2 = scmp.lt.s32.totalorder %s1212_s23, %s831_s10  ;;  %p834_p4 = scmp.lt.s32.totalorder %s832_s8, %s826_s1 }
  0xc3   : > { %p829_p12 = pneg %p828_p7 }
  0xc4   : > { %p835_p0 = por %p834_p4, %p833_p2 }
  0xc6   : > { %p836_p13 = pnand %p835_p0, %p829_p12 }
  0xc8   : > { %839 = shalt.err (!%p836_p13)
}
  0xc9   : > { %s840_s17 = scalar_lea.hbm %s403_s26, 128  ;;  %s844_s15 = scalar_lea.hbm %s1262_s5, 256 }
  0xca   : > { %p841_p1 = scmp.ne.s32.totalorder %s403_s26, %s840_s17  ;;  %p845_p6 = scmp.lt.u32.totalorder %s403_s26, %s1262_s5 }
  0xcb   : > { %p846_p11 = scmp.lt.u32.totalorder %s844_s15, %s840_s17  ;;  %p848_p10 = scmp.lt.u32.totalorder %s840_s17, %s403_s26 }
  0xcc   : > { %p842_p9 = pnand %p841_p1, %p1281_p5 }
  0xcd   : > { %p847_p8 = por %p846_p11, %p845_p6 }
  0xce   : > { %p843_p3 = pneg %p842_p9 }
  0xcf   : > { %p849_p7 = por %p848_p10, %p847_p8 }
  0xd1   : > { %p850_p12 = pnand %p849_p7, %p843_p3 }
  0xd3   : > { %853 = shalt.err (!%p850_p12)
}
  0xd4   : > { %617 = dma.vmem_to_hbm [thread:$0]  (%p1281_p5), %s1212_s23, 128, %s403_s26, %s1186_s25  }
  0xd5 PF: > { %s417_s6 = sand.u32 1, %s888_s18   ;;  %p1282_p2 = scmp.ne.s32.totalorder %s1272_s30, 0 }
  0xd6   : > { %p1283_p4 = scmp.ge.s32.totalorder %s900_s21, 2  ;;  %s418_s7 = scalar_lea.sflag [#allocation4], %s417_s6 }
  0xd8   : > { %p632_p0 = pnand %p1283_p4, %p1282_p2 }
  0xda   : > { %879 = dma.done.wait (!%p632_p0), %s418_s7, 128  }
  0xdb   : > { %881 = vsyncadd (!%p632_p0), %s418_s7, 4294967168  ;;  %s1284_s13 = sadd.s32 4294967294, %s900_s21  }
  0xdc   : > { %s426_s28 = sand.u32 1, %s1284_s13  }
  0xdd   : > { %s427_s11 = scalar_lea.sflag [#allocation10], %s426_s28 }
  0xde   : > { %883 = dma.done.wait (!%p632_p0), %s427_s11, 256  }
  0xdf   : > { %885 = vsyncadd (!%p632_p0), %s427_s11, 4294967040  ;;  %s1285_s29 = sld [smem:[#allocation16_spill]]  ;;  %p25_p5 = scmp.ge.s32.totalorder %s963_s24, 4  }
  0xe0   : > { %s1286_s18 = smov %s892_s19  ;;  %s1287_s19 = smov %s896_s20 }
  0xe1   : > { %s1289_s21 = smov %s963_s24  ;;  %27 = sbr.rel (!%p25_p5) target bundleno = 11 (0xb), region = 133 }
  0xe5   : > { %s1288_s20 = smov %s1285_s29 }
  0xe8   :  { %441 = vsyncpa [#allocation3], 1 }
  0xe9   :  { %443 = vsyncpa [#allocation3 + $0x1], 1 }
  0xea   :  { %444 = vsyncpa [#allocation6], 1 }
  0xeb   :  { %446 = vsyncpa [#allocation6 + $0x1], 1 }
  0xec   :  { %447 = vsyncpa [#allocation4], 1 }
  0xed   :  { %449 = vsyncpa [#allocation4 + $0x1], 1 }
  0xee   :  { %450 = vsyncpa [#allocation10], 1 }
  0xef   :  { %452 = vsyncpa [#allocation10 + $0x1], 1 }

</bundles_post_ra>
